<compile_context>
chip_gen: v6e
topology: v6e:2x2x1
jax: 0.10.0
libtpu: 0.0.40
codegen_flags: <defaults>
</compile_context>

<pallas_src>
import functools

import jax
import jax.numpy as jnp
from jax.experimental import pallas as pl
from jax.experimental.pallas import tpu as pltpu

H1 = 128   # fc1 width
H2 = 64    # fc2 width


def _mlp_kernel(x_ref, w1_ref, b1_ref, w2_ref, b2_ref, w3_ref, b3_ref, o_ref):
    # fc1 + ReLU.  x is f32 in VMEM; cast to bf16 right before the MXU dot
    # (VPU cast hides under the DMA), accumulate in f32, bias add in f32.
    x = x_ref[...].astype(jnp.bfloat16)
    h1 = jnp.dot(x, w1_ref[...], preferred_element_type=jnp.float32)
    h1 = jnp.maximum(h1 + b1_ref[...], 0.0)
    # dropout(p=0.5) -> identity at inference time.
    # fc2 + ReLU
    h2 = jnp.dot(h1.astype(jnp.bfloat16), w2_ref[...],
                 preferred_element_type=jnp.float32)
    h2 = jnp.maximum(h2 + b2_ref[...], 0.0)
    # fc3 (logits), stored narrow (num_classes lanes) in bf16.
    out = jnp.dot(h2.astype(jnp.bfloat16), w3_ref[...],
                  preferred_element_type=jnp.float32)
    o_ref[...] = (out + b3_ref[...]).astype(o_ref.dtype)


def _round_up(v, m):
    return ((v + m - 1) // m) * m


def prepare_params(params):
    """One-time conversion of f32 Linear params ([in,out] weights, [1,out] biases)
    into kernel operands: bf16 weights, f32 biases.  Do this once and reuse."""
    w1, b1, w2, b2, w3, b3 = params
    bf = jnp.bfloat16
    return (w1.astype(bf), b1, w2.astype(bf), b2, w3.astype(bf), b3)


@functools.partial(jax.jit, static_argnames=("block_m",))
def collision_classifier_mlp(x, kparams, *, block_m=1024):
    """Fused forward pass.

    x:       [B, F] float32
    kparams: output of prepare_params (bf16 weights, f32 biases)
    returns: [B, num_classes] bfloat16 logits
    """
    w1b, b1, w2b, b2, w3b, b3 = kparams
    B, F = x.shape
    num_classes = w3b.shape[1]

    # Row tile: multiple of 16 (bf16 sublane packing on the output), as large
    # as block_m, but capped so the grid has >= 2 steps when B allows it
    # (v7x: two TensorCores share the "parallel" batch axis).
    tm = max(16, min(block_m, _round_up(pl.cdiv(B, 2), 16)))
    grid = (pl.cdiv(B, tm),)   # ragged last tile handled by Pallas masking

    resident = lambda shape: pl.BlockSpec(shape, lambda i: (0, 0))

    flops = 2 * B * (F * H1 + H1 * H2 + H2 * num_classes)
    bytes_accessed = (
        B * F * 4                                   # x (f32)
        + w1b.size * 2 + w2b.size * 2 + w3b.size * 2  # bf16 weights
        + b1.size * 4 + b2.size * 4 + b3.size * 4     # f32 biases
        + B * num_classes * 2                          # bf16 logits
    )

    return pl.pallas_call(
        _mlp_kernel,
        out_shape=jax.ShapeDtypeStruct((B, num_classes), jnp.bfloat16),
        grid=grid,
        in_specs=[
            pl.BlockSpec((tm, F), lambda i: (i, 0)),          # x: tiled over batch
            resident((F, H1)), resident((1, H1)),             # fc1 (VMEM-resident)
            resident((H1, H2)), resident((1, H2)),            # fc2
            resident((H2, num_classes)), resident((1, num_classes)),  # fc3
        ],
        out_specs=pl.BlockSpec((tm, num_classes), lambda i: (i, 0)),
        compiler_params=pltpu.CompilerParams(
            dimension_semantics=("parallel",),    # v7x: 2 TCs split batch tiles
        ),
        cost_estimate=pl.CostEstimate(
            flops=flops, transcendentals=0, bytes_accessed=bytes_accessed),
    )(x, w1b, b1, w2b, b2, w3b, b3)


def init_params(key, input_size, num_classes):
    """Deterministic init mimicking nn.Linear default (U[-1/sqrt(fan_in), +1/sqrt(fan_in)])."""
    def linear(key, fan_in, fan_out):
        kw, kb = jax.random.split(key)
        bound = 1.0 / jnp.sqrt(fan_in)
        # stored as [in, out] so kernel does x @ W; bias as [1, out]
        w = jax.random.uniform(kw, (fan_in, fan_out), jnp.float32, -bound, bound)
        b = jax.random.uniform(kb, (1, fan_out), jnp.float32, -bound, bound)
        return w, b

    k1, k2, k3 = jax.random.split(key, 3)
    w1, b1 = linear(k1, input_size, H1)
    w2, b2 = linear(k2, H1, H2)
    w3, b3 = linear(k3, H2, num_classes)
    return (w1, b1, w2, b2, w3, b3)


def reference_forward(x, params):
    """Pure-JAX reference following the same bf16-operand / f32-accumulate path."""
    w1, b1, w2, b2, w3, b3 = params
    bf = jnp.bfloat16
    h1 = jnp.maximum(
        jnp.dot(x.astype(bf), w1.astype(bf), preferred_element_type=jnp.float32) + b1, 0.0)
    h2 = jnp.maximum(
        jnp.dot(h1.astype(bf), w2.astype(bf), preferred_element_type=jnp.float32) + b2, 0.0)
    return jnp.dot(h2.astype(bf), w3.astype(bf), preferred_element_type=jnp.float32) + b3


def reference_forward_f32(x, params):
    w1, b1, w2, b2, w3, b3 = params
    h1 = jnp.maximum(x @ w1 + b1, 0.0)
    h2 = jnp.maximum(h1 @ w2 + b2, 0.0)
    return h2 @ w3 + b3


if __name__ == "__main__":
    # Shapes implied by the module: input_size = fixed_features (pick 32 here),
    # num_classes = len(set(collision_type)) = 3.
    collision_type = [3, 3, 3, 1, 1, 1, 2, 2, 2, 2, 3, 3, 3, 3, 3,
                      2, 2, 2, 2, 2, 1, 1, 1, 1, 1, 1, 3, 3, 3]
    num_classes = len(set(collision_type))   # 3
    input_size = 32
    batch = 100                              # 2 grid steps, ragged last tile

    key = jax.random.PRNGKey(0)
    k_x, k_p = jax.random.split(key)
    x = jax.random.normal(k_x, (batch, input_size), jnp.float32)
    params = init_params(k_p, input_size, num_classes)
    kparams = prepare_params(params)         # one-time bf16 weight cast

    out = collision_classifier_mlp(x, kparams)
    out = jax.block_until_ready(out)
    assert out.shape == (batch, num_classes)
    assert out.dtype == jnp.bfloat16

    out_f32 = out.astype(jnp.float32)

    # same-path reference (bf16 operands / f32 accumulation); output is bf16-rounded
    ref = reference_forward(x, params)
    assert jnp.allclose(out_f32, ref, atol=1e-2, rtol=1e-2)

    # sanity vs full-f32 math (looser, bf16 operand + output rounding)
    ref32 = reference_forward_f32(x, params)
    assert jnp.allclose(out_f32, ref32, atol=5e-2, rtol=5e-2)

    print("KERNEL_OK")
</pallas_src>

<mosaic_0001>
module attributes {stable_mosaic.version = 11 : i64} {
  func.func @_mlp_kernel(%arg0: i32, %arg1: memref<64x32xf32, #tpu.memory_space<vmem>>, %arg2: memref<32x128xbf16, #tpu.memory_space<vmem>>, %arg3: memref<1x128xf32, #tpu.memory_space<vmem>>, %arg4: memref<128x64xbf16, #tpu.memory_space<vmem>>, %arg5: memref<1x64xf32, #tpu.memory_space<vmem>>, %arg6: memref<64x3xbf16, #tpu.memory_space<vmem>>, %arg7: memref<1x3xf32, #tpu.memory_space<vmem>>, %arg8: memref<64x3xbf16, #tpu.memory_space<vmem>>) attributes {dimension_semantics = [#tpu.dimension_semantics<parallel>], iteration_bounds = array<i64: 2>, scalar_prefetch = 0 : i64, scratch_operands = 0 : i64, tpu.core_type = #tpu.core_type<tc>, window_params = [{transform_indices = @transform_0, window_bounds = array<i64: 64, 32>}, {pipeline_mode = #tpu.pipeline_mode<synchronous>, transform_indices = @transform_1, window_bounds = array<i64: 32, 128>}, {pipeline_mode = #tpu.pipeline_mode<synchronous>, transform_indices = @transform_2, window_bounds = array<i64: 1, 128>}, {pipeline_mode = #tpu.pipeline_mode<synchronous>, transform_indices = @transform_3, window_bounds = array<i64: 128, 64>}, {pipeline_mode = #tpu.pipeline_mode<synchronous>, transform_indices = @transform_4, window_bounds = array<i64: 1, 64>}, {pipeline_mode = #tpu.pipeline_mode<synchronous>, transform_indices = @transform_5, window_bounds = array<i64: 64, 3>}, {pipeline_mode = #tpu.pipeline_mode<synchronous>, transform_indices = @transform_6, window_bounds = array<i64: 1, 3>}, {transform_indices = @transform_7, window_bounds = array<i64: 64, 3>}]} {
    %c0 = arith.constant 0 : index
    %c0_0 = arith.constant 0 : index
    %0 = vector.load %arg1[%c0, %c0_0] : memref<64x32xf32, #tpu.memory_space<vmem>>, vector<64x32xf32>
    %1 = arith.truncf %0 : vector<64x32xf32> to vector<64x32xbf16>
    %c0_1 = arith.constant 0 : index
    %c0_2 = arith.constant 0 : index
    %2 = vector.load %arg2[%c0_1, %c0_2] : memref<32x128xbf16, #tpu.memory_space<vmem>>, vector<32x128xbf16>
    %cst = arith.constant dense<0.000000e+00> : vector<64x128xf32>
    %3 = tpu.matmul %1, %2, %cst {dimension_numbers = #tpu.dot_dimension_numbers<[1], [0], [0], [1], [0, 0, 1, 1], [], []>} : vector<64x32xbf16>, vector<32x128xbf16>, vector<64x128xf32> -> vector<64x128xf32>
    %c0_3 = arith.constant 0 : index
    %c0_4 = arith.constant 0 : index
    %4 = vector.load %arg3[%c0_3, %c0_4] : memref<1x128xf32, #tpu.memory_space<vmem>>, vector<1x128xf32>
    %5 = vector.broadcast %4 : vector<1x128xf32> to vector<64x128xf32>
    %6 = arith.addf %3, %5 : vector<64x128xf32>
    %cst_5 = arith.constant 0.000000e+00 : f32
    %7 = vector.broadcast %cst_5 : f32 to vector<64x128xf32>
    %8 = arith.maximumf %6, %7 : vector<64x128xf32>
    %9 = arith.truncf %8 : vector<64x128xf32> to vector<64x128xbf16>
    %c0_6 = arith.constant 0 : index
    %c0_7 = arith.constant 0 : index
    %10 = vector.load %arg4[%c0_6, %c0_7] : memref<128x64xbf16, #tpu.memory_space<vmem>>, vector<128x64xbf16>
    %cst_8 = arith.constant dense<0.000000e+00> : vector<64x64xf32>
    %11 = tpu.matmul %9, %10, %cst_8 {dimension_numbers = #tpu.dot_dimension_numbers<[1], [0], [0], [1], [0, 0, 1, 1], [], []>} : vector<64x128xbf16>, vector<128x64xbf16>, vector<64x64xf32> -> vector<64x64xf32>
    %c0_9 = arith.constant 0 : index
    %c0_10 = arith.constant 0 : index
    %12 = vector.load %arg5[%c0_9, %c0_10] : memref<1x64xf32, #tpu.memory_space<vmem>>, vector<1x64xf32>
    %13 = vector.broadcast %12 : vector<1x64xf32> to vector<64x64xf32>
    %14 = arith.addf %11, %13 : vector<64x64xf32>
    %cst_11 = arith.constant 0.000000e+00 : f32
    %15 = vector.broadcast %cst_11 : f32 to vector<64x64xf32>
    %16 = arith.maximumf %14, %15 : vector<64x64xf32>
    %17 = arith.truncf %16 : vector<64x64xf32> to vector<64x64xbf16>
    %c0_12 = arith.constant 0 : index
    %c0_13 = arith.constant 0 : index
    %18 = vector.load %arg6[%c0_12, %c0_13] : memref<64x3xbf16, #tpu.memory_space<vmem>>, vector<64x3xbf16>
    %cst_14 = arith.constant dense<0.000000e+00> : vector<64x3xf32>
    %19 = tpu.matmul %17, %18, %cst_14 {dimension_numbers = #tpu.dot_dimension_numbers<[1], [0], [0], [1], [0, 0, 1, 1], [], []>} : vector<64x64xbf16>, vector<64x3xbf16>, vector<64x3xf32> -> vector<64x3xf32>
    %c0_15 = arith.constant 0 : index
    %c0_16 = arith.constant 0 : index
    %20 = vector.load %arg7[%c0_15, %c0_16] : memref<1x3xf32, #tpu.memory_space<vmem>>, vector<1x3xf32>
    %21 = vector.broadcast %20 : vector<1x3xf32> to vector<64x3xf32>
    %22 = arith.addf %19, %21 : vector<64x3xf32>
    %23 = arith.truncf %22 : vector<64x3xf32> to vector<64x3xbf16>
    %c0_17 = arith.constant 0 : index
    %c0_18 = arith.constant 0 : index
    %24 = vector.load %arg8[%c0_17, %c0_18] : memref<64x3xbf16, #tpu.memory_space<vmem>>, vector<64x3xbf16>
    tpu.vector_store %arg8[%c0_17, %c0_18], %23 {strides = array<i32>} : memref<64x3xbf16, #tpu.memory_space<vmem>>, vector<64x3xbf16>,
    return
  }
  func.func @transform_0(%arg0: i32) -> (i32, i32) {
    %c0_i32 = arith.constant 0 : i32
    %c0_i32_0 = arith.constant 0 : i32
    return %arg0, %c0_i32 : i32, i32
  }
  func.func @transform_1(%arg0: i32) -> (i32, i32) {
    %c0_i32 = arith.constant 0 : i32
    %c0_i32_0 = arith.constant 0 : i32
    %c0_i32_1 = arith.constant 0 : i32
    return %c0_i32, %c0_i32_0 : i32, i32
  }
  func.func @transform_2(%arg0: i32) -> (i32, i32) {
    %c0_i32 = arith.constant 0 : i32
    %c0_i32_0 = arith.constant 0 : i32
    %c0_i32_1 = arith.constant 0 : i32
    return %c0_i32, %c0_i32_0 : i32, i32
  }
  func.func @transform_3(%arg0: i32) -> (i32, i32) {
    %c0_i32 = arith.constant 0 : i32
    %c0_i32_0 = arith.constant 0 : i32
    %c0_i32_1 = arith.constant 0 : i32
    return %c0_i32, %c0_i32_0 : i32, i32
  }
  func.func @transform_4(%arg0: i32) -> (i32, i32) {
    %c0_i32 = arith.constant 0 : i32
    %c0_i32_0 = arith.constant 0 : i32
    %c0_i32_1 = arith.constant 0 : i32
    return %c0_i32, %c0_i32_0 : i32, i32
  }
  func.func @transform_5(%arg0: i32) -> (i32, i32) {
    %c0_i32 = arith.constant 0 : i32
    %c0_i32_0 = arith.constant 0 : i32
    %c0_i32_1 = arith.constant 0 : i32
    return %c0_i32, %c0_i32_0 : i32, i32
  }
  func.func @transform_6(%arg0: i32) -> (i32, i32) {
    %c0_i32 = arith.constant 0 : i32
    %c0_i32_0 = arith.constant 0 : i32
    %c0_i32_1 = arith.constant 0 : i32
    return %c0_i32, %c0_i32_0 : i32, i32
  }
  func.func @transform_7(%arg0: i32) -> (i32, i32) {
    %c0_i32 = arith.constant 0 : i32
    %c0_i32_0 = arith.constant 0 : i32
    return %arg0, %c0_i32 : i32, i32
  }
}

</mosaic_0001>

<bundles_post_ra>
// kernel: collision_classifier_mlp.1
= control target key start
LH: loop header
LB: loop body
LE: loop exit
PB: predicated region body
PF: predicated region fallthrough
CT: control target
= control target key end

     0   :  { %s1352_s24 = smov 0   ;;  %s1354_s25 = smov 0   ;;  %s1528_s0 = inlined_call_operand.vmem [shape: f32[100,32], index: 0, kind: input, shape index: {}]   ;;  %s1529_s1 = inlined_call_operand.vmem [shape: bf16[32,128], index: 1, kind: input, shape index: {}]   ;;  %s1530_s2 = inlined_call_operand.vmem [shape: f32[1,128], index: 2, kind: input, shape index: {}]   ;;  %s1531_s3 = inlined_call_operand.vmem [shape: bf16[128,64], index: 3, kind: input, shape index: {}]   ;;  %s1532_s4 = inlined_call_operand.vmem [shape: f32[1,64], index: 4, kind: input, shape index: {}]   ;;  %s1533_s5 = inlined_call_operand.vmem [shape: bf16[64,3], index: 5, kind: input, shape index: {}]   ;;  %s1534_s6 = inlined_call_operand.vmem [shape: f32[1,3], index: 6, kind: input, shape index: {}]   ;;  %s1535_s7 = inlined_call_operand.vmem [shape: bf16[100,3], index: 7, kind: output, shape index: {}]  }
   0x1   :  { %s1356_s26 = smov 0  }
   0x2 LB: > { %s1365_s27 = sadd.s32 4294967295, %s1278_s26   ;;  %s1367_s28 = sadd.s32 1, %s1278_s26   ;;  %s1278_s26 = sphi %s1356_s26, %s1542_s26   ;;  %s1274_s25 = sphi %s1354_s25, %s1541_s25   ;;  %s1270_s24 = sphi %s1352_s24, %s1540_s24  }
   0x3   : > { %s173_s29 = ssub.s32 %s1278_s26, %s1367_s28  ;;  %s176_s30 = sadd.s32 1, %s1274_s25 }
   0x4   : > { %p174_p0 = scmp.eq.s32.totalorder %s173_s29, 0  ;;  %p186_p1 = scmp.ne.s32.totalorder %s1274_s25, %s1270_s24 }
   0x5   : > { %p187_p2 = scmp.eq.s32.totalorder %s1365_s27, 1  ;;  %p979_p3 = scmp.ge.s32.totalorder %s1278_s26, 1 }
   0x6   : > { %s1375_s8 = scalar_select %p174_p0, %s1274_s25, %s176_s30  }
   0x7   : > { %p1377_p4 = por %p187_p2, %p186_p1  ;;  %p246_p5 = scmp.lt.s32.totalorder %s1278_s26, 3 }
   0x9   : > { %p247_p6 = pnand %p979_p3, %p246_p5 }
   0xa   : > { %s1385_s12 = sshll.u32 (!%p247_p6), %s1365_s27, 3  ;;  %s278_s16 = sand.u32 (!%p247_p6), 1, %s1270_s24  }
   0xb   : > { %250 = sbr.rel (%p247_p6) target bundleno = 693 (0x2b5), region = 48  ;;  %p286_p7 = scmp.lt.s32.totalorder (!%p247_p6), %s1385_s12, 12 }
   0xc   : > { %s980_s19 = sshll.u32 (!%p247_p6), %s278_s16, 5 }
  0x10   : > { %v1210_v0 = vld [vmem:[%s1529_s1 + $0x8] sm:$0xff]   ;;  %v1211_v1 = vld [vmem:[%s1529_s1] sm:$0xff]   ;;  %v1212_v2 = vld [vmem:[%s1531_s3 + $0x38] sm:$0xff]   ;;  %s287_s17 = scalar_select %p286_p7, %s1385_s12, 12  ;;  %vm336_vm0 = vcmask 261120   ;;  %vm613_vm1 = vcmask 523264  }
  0x11   : > { %1070 = vmatprep.subr.bf16.mxu0 %v1210_v0  ;;  %v1213_v3 = vld [vmem:[%s1531_s3 + $0x30] sm:$0xff]   ;;  %1082 = vmatprep.subr.bf16.mxu1 %v1212_v2  ;;  %v1214_v4 = vld [vmem:[%s1531_s3 + $0x28] sm:$0xff]   ;;  %v1215_v14 = vld [vmem:[%s1531_s3 + $0x20] sm:$0xff]   ;;  %vm723_vm2 = vcmask 19456   ;;  %s740_s24 = ssub.s32 (%p1377_p4), 13, %s1385_s12  ;;  %s1041_s21 = sshll.u32 (%p1377_p4), %s1365_s27, 5 }
  0x12   : > { %1071 = vmatpush3.bf16.msra.mxu0 %v1210_v0  ;;  %s982_s20 = sshll.u32 %s287_s17, 3  ;;  %1083 = vmatpush3.bf16.msra.mxu1 %v1212_v2  ;;  %v1216_v17 = vld [vmem:[%s1531_s3 + $0x18] sm:$0xff]   ;;  %v1217_v19 = vld [vmem:[%s1531_s3 + $0x10] sm:$0xff]   ;;  %v1218_v20 = vld [vmem:[%s1531_s3 + $0x8] sm:$0xff]   ;;  %p741_p8 = scmp.lt.s32.totalorder (%p1377_p4), %s740_s24, 8 }
  0x13   : > { %1072 = vmatprep.subr.bf16.mxu0 %v1211_v1  ;;  %s289_s23 = scalar_lea.vmem %s1528_s0, %s982_s20  ;;  %1084 = vmatprep.subr.bf16.mxu1 %v1213_v3  ;;  %v1219_v21 = vld [vmem:[%s1531_s3] sm:$0xff]   ;;  %v1220_v22 = vld [vmem:[%s1533_s5 + $0x18] sm:$0xff]   ;;  %v1221_v52 = vld [vmem:[%s1533_s5 + $0x10] sm:$0xff]   ;;  %s1449_s20 = scalar_lea.vmem [#allocation2], %s980_s19  }
  0x14   : > { %v301_v5 = vld [vmem:[%s289_s23] sm:$0xff]  ;;  %v302_v6 = vld [vmem:[%s289_s23 + $0x8] sm:$0xff]  ;;  %v303_v7 = vld [vmem:[%s289_s23 + $0x10] sm:$0xff]  ;;  %s1474_s26 = scalar_lea.vmem (%p1377_p4), %s1535_s7, %s1041_s21  }
  0x15   : > { %v309_v8 = vpack.c.bf16 %v302_v6, %v301_v5  ;;  %v304_v9 = vld [vmem:[%s289_s23 + $0x18] sm:$0xff]  ;;  %v305_v10 = vld [vmem:[%s289_s23 + $0x20] sm:$0xff]  ;;  %v306_v11 = vld [vmem:[%s289_s23 + $0x28] sm:$0xff] }
  0x16   : > { %1073 = vmatpush3.bf16.msra.mxu0 %v1211_v1  ;;  %v310_v12 = vpack.c.bf16 %v304_v9, %v303_v7  ;;  %v311_v13 = vpack.c.bf16 %v306_v11, %v305_v10  ;;  %1085 = vmatpush3.bf16.msra.mxu1 %v1213_v3  ;;  %v307_v15 = vld [vmem:[%s289_s23 + $0x30] sm:$0xff]  ;;  %v308_v16 = vld [vmem:[%s289_s23 + $0x38] sm:$0xff]  ;;  %v983_v25 = vld [vmem:[%s1530_s2] ss:$0 sm:$0xff] }
  0x17   : > { %1074 = vmatprep.mubr.msk.bf16.mxu0 %vm336_vm0, %v309_v8  ;;  %1086 = vmatprep.subr.bf16.mxu1 %v1214_v4  ;;  %v312_v18 = vpack.c.bf16 %v308_v16, %v307_v15  ;;  %v1222_v53 = vld [vmem:[%s1533_s5 + $0x8] sm:$0xff]   ;;  %v1223_v54 = vld [vmem:[%s1533_s5] sm:$0xff]  }
  0x18   : > { %1106 = vmatprep.subr.bf16.mxu0 %v1220_v22  ;;  %v990_v57 = vld [vmem:[%s1532_s4] ss:$0 sm:$0xff] }
  0x19   : > { %1075 = vmatmul.mubr.msk.bf16.vlgmr.msra.gmra.mxu0 %vm336_vm0, %v310_v12 }
  0x1a   : > { %1078 = vmatprep.mubr.msk.bf16.mxu0 %vm336_vm0, %v311_v13  ;;  %1087 = vmatpush3.bf16.msra.mxu1 %v1214_v4 }
  0x1b   : > { %1088 = vmatprep.subr.bf16.mxu1 %v1215_v14  ;;  %1107 = vmatpush3.bf16.msra.mxu0 %v1220_v22 }
  0x1c   : > { %1108 = vmatprep.subr.bf16.mxu0 %v1221_v52 }
  0x1e   : > { %1089 = vmatpush3.bf16.msra.mxu1 %v1215_v14 }
  0x1f   : > { %1090 = vmatprep.subr.bf16.mxu1 %v1216_v17  ;;  %1109 = vmatpush3.bf16.msra.mxu0 %v1221_v52 }
  0x20   : > { %1110 = vmatprep.subr.bf16.mxu0 %v1222_v53 }
  0x21   : > { %1079 = vmatmul.mubr.msk.bf16.gmra.mxu0 %vm336_vm0, %v312_v18 }
  0x22   : > { %1091 = vmatpush3.bf16.msra.mxu1 %v1216_v17 }
  0x23   : > { %1092 = vmatprep.subr.bf16.mxu1 %v1217_v19  ;;  %1111 = vmatpush3.bf16.msra.mxu0 %v1222_v53 }
  0x24   : > { %1112 = vmatprep.subr.bf16.mxu0 %v1223_v54 }
  0x26   : > { %1093 = vmatpush3.bf16.msra.mxu1 %v1217_v19 }
  0x27   : > { %1094 = vmatprep.subr.bf16.mxu1 %v1218_v20  ;;  %1113 = vmatpush3.bf16.msra.mxu0 %v1223_v54 }
  0x2a   : > { %1095 = vmatpush3.bf16.msra.mxu1 %v1218_v20  ;;  %v999_v20 = vld [vmem:[%s1534_s6] ss:$0 sm:$0xff] }
  0x2b   : > { %1096 = vmatprep.subr.bf16.mxu1 %v1219_v21 }
  0x2e   : > { %1097 = vmatpush3.bf16.msra.mxu1 %v1219_v21 }
  0xd9   : > { %v1076_v23 = vpop.f32.mrf.mxu0 }
  0xda   : > { %v392_v29 = vadd.f32 %v1076_v23, %v983_v25 }
  0xdb   : > { %v383_v24 = vpop.f32.mrf.mxu0 }
  0xdc   : > { %v384_v27 = vadd.f32 %v983_v25, %v383_v24  ;;  %v416_v36 = vmax.f32 %v392_v29, 0.0 }
  0xdd   : > { %v1077_v26 = vpop.f32.mrf.mxu0 }
  0xde   : > { %v395_v28 = vadd.f32 %v1077_v26, %v983_v25  ;;  %v414_v34 = vmax.f32 %v384_v27, 0.0 }
  0xdf   : > { %v386_v30 = vpop.f32.mrf.mxu0 }
  0xe0   : > { %v387_v31 = vadd.f32 %v983_v25, %v386_v30  ;;  %v417_v32 = vmax.f32 %v395_v28, 0.0 }
  0xe1   : > { %v1080_v33 = vpop.f32.mrf.mxu0 }
  0xe2   : > { %v415_v35 = vmax.f32 %v387_v31, 0.0  ;;  %v423_v39 = vpack.c.bf16 %v417_v32, %v416_v36  ;;  %v408_v43 = vadd.f32 %v1080_v33, %v983_v25 }
  0xe3   : > { %v399_v37 = vpop.f32.mrf.mxu0 }
  0xe4   : > { %v422_v38 = vpack.c.bf16 %v415_v35, %v414_v34  ;;  %v400_v41 = vadd.f32 %v983_v25, %v399_v37  ;;  %v420_v49 = vmax.f32 %v408_v43, 0.0 }
  0xe5   : > { %v1081_v40 = vpop.f32.mrf.mxu0 }
  0xe6   : > { %v411_v42 = vadd.f32 %v1081_v40, %v983_v25  ;;  %1098 = vmatprep.mubr.bf16.mxu1 %v422_v38  ;;  %v418_v47 = vmax.f32 %v400_v41, 0.0 }
  0xe7   : > { %v402_v44 = vpop.f32.mrf.mxu0  ;;  %1099 = vmatmul.mubr.bf16.vlgmr.msra.gmra.mxu1 %v423_v39 }
  0xe8   : > { %v403_v45 = vadd.f32 %v983_v25, %v402_v44  ;;  %v421_v46 = vmax.f32 %v411_v42, 0.0 }
  0xea   : > { %v419_v48 = vmax.f32 %v403_v45, 0.0  ;;  %v425_v51 = vpack.c.bf16 %v421_v46, %v420_v49 }
  0xec   : > { %v424_v50 = vpack.c.bf16 %v419_v48, %v418_v47 }
  0xee   : > { %1102 = vmatprep.mubr.bf16.mxu1 %v424_v50 }
  0xef   : > { %1103 = vmatmul.mubr.bf16.gmra.mxu1 %v425_v51 }
 0x1a7   : > { %v1100_v55 = vpop.f32.mrf.mxu1 }
 0x1a8   : > { %v540_v61 = vadd.f32 %v1100_v55, %v990_v57 }
 0x1a9   : > { %v531_v56 = vpop.f32.mrf.mxu1 }
 0x1aa   : > { %v532_v59 = vadd.f32 %v990_v57, %v531_v56  ;;  %v564_v4 = vmax.f32 %v540_v61, 0.0 }
 0x1ab   : > { %v1101_v58 = vpop.f32.mrf.mxu1 }
 0x1ac   : > { %v543_v60 = vadd.f32 %v1101_v58, %v990_v57  ;;  %v562_v2 = vmax.f32 %v532_v59, 0.0 }
 0x1ad   : > { %v534_v62 = vpop.f32.mrf.mxu1 }
 0x1ae   : > { %v535_v63 = vadd.f32 %v990_v57, %v534_v62  ;;  %v565_v0 = vmax.f32 %v543_v60, 0.0 }
 0x1af   : > { %v1104_v1 = vpop.f32.mrf.mxu1 }
 0x1b0   : > { %v563_v3 = vmax.f32 %v535_v63, 0.0  ;;  %v571_v7 = vpack.c.bf16 %v565_v0, %v564_v4  ;;  %v556_v11 = vadd.f32 %v1104_v1, %v990_v57 }
 0x1b1   : > { %v547_v5 = vpop.f32.mrf.mxu1 }
 0x1b2   : > { %v570_v6 = vpack.c.bf16 %v563_v3, %v562_v2  ;;  %v548_v9 = vadd.f32 %v990_v57, %v547_v5  ;;  %v568_v17 = vmax.f32 %v556_v11, 0.0 }
 0x1b3   : > { %v1105_v8 = vpop.f32.mrf.mxu1 }
 0x1b4   : > { %v559_v10 = vadd.f32 %v1105_v8, %v990_v57  ;;  %1114 = vmatprep.mubr.msk.bf16.mxu0 %vm613_vm1, %v570_v6  ;;  %v566_v15 = vmax.f32 %v548_v9, 0.0 }
 0x1b5   : > { %v550_v12 = vpop.f32.mrf.mxu1  ;;  %1115 = vmatmul.mubr.msk.bf16.vlgmr.msra.gmra.mxu0 %vm613_vm1, %v571_v7 }
 0x1b6   : > { %v551_v13 = vadd.f32 %v990_v57, %v550_v12  ;;  %v569_v14 = vmax.f32 %v559_v10, 0.0 }
 0x1b8   : > { %v567_v16 = vmax.f32 %v551_v13, 0.0  ;;  %v573_v19 = vpack.c.bf16 %v569_v14, %v568_v17 }
 0x1ba   : > { %v572_v18 = vpack.c.bf16 %v567_v16, %v566_v15 }
 0x1bc   : > { %1118 = vmatprep.mubr.msk.bf16.mxu0 %vm613_vm1, %v572_v18 }
 0x1bd   : > { %1119 = vmatmul.mubr.msk.bf16.gmra.mxu0 %vm613_vm1, %v573_v19 }
 0x275   : > { %v1116_v21 = vpop.f32.mrf.mxu0 }
 0x276   : > { %v669_v22 = vadd.f32 %v1116_v21, %v999_v20 }
 0x277   : > { %v660_v23 = vpop.f32.mrf.mxu0 }
 0x278   : > { %v1035_v24 = vpack.c.bf16 %v669_v22, %v669_v22  ;;  %v661_v25 = vadd.f32 %v999_v20, %v660_v23 }
 0x279   : > { %v1117_v26 = vpop.f32.mrf.mxu0 }
 0x27a   : > { %726 = vst.msk [vmem:[%s1449_s20 + $0x8] sm:$0xf] %vm723_vm2, %v1035_v24  ;;  %v1033_v27 = vpack.c.bf16 %v661_v25, %v661_v25  ;;  %v672_v28 = vadd.f32 %v1117_v26, %v999_v20 }
 0x27b   : > { %v663_v29 = vpop.f32.mrf.mxu0 }
 0x27c   : > { %724 = vst.msk [vmem:[%s1449_s20] sm:$0xf] %vm723_vm2, %v1033_v27  ;;  %v1036_v30 = vpack.c.bf16 %v672_v28, %v672_v28  ;;  %v664_v31 = vadd.f32 %v999_v20, %v663_v29 }
 0x27d   : > { %v1120_v32 = vpop.f32.mrf.mxu0 }
 0x27e   : > { %727 = vst.msk [vmem:[%s1449_s20 + $0xc] sm:$0xf] %vm723_vm2, %v1036_v30  ;;  %v1034_v33 = vpack.c.bf16 %v664_v31, %v664_v31  ;;  %v685_v34 = vadd.f32 %v1120_v32, %v999_v20 }
 0x27f   : > { %v676_v35 = vpop.f32.mrf.mxu0 }
 0x280   : > { %725 = vst.msk [vmem:[%s1449_s20 + $0x4] sm:$0xf] %vm723_vm2, %v1034_v33  ;;  %v1039_v36 = vpack.c.bf16 %v685_v34, %v685_v34  ;;  %v677_v37 = vadd.f32 %v999_v20, %v676_v35 }
 0x281   : > { %v1121_v38 = vpop.f32.mrf.mxu0 }
 0x282   : > { %730 = vst.msk [vmem:[%s1449_s20 + $0x18] sm:$0xf] %vm723_vm2, %v1039_v36  ;;  %v1037_v39 = vpack.c.bf16 %v677_v37, %v677_v37  ;;  %v688_v40 = vadd.f32 %v1121_v38, %v999_v20 }
 0x283   : > { %v679_v41 = vpop.f32.mrf.mxu0 }
 0x284   : > { %728 = vst.msk [vmem:[%s1449_s20 + $0x10] sm:$0xf] %vm723_vm2, %v1037_v39  ;;  %v1040_v42 = vpack.c.bf16 %v688_v40, %v688_v40  ;;  %v680_v43 = vadd.f32 %v999_v20, %v679_v41  ;;  %738 = sbr.rel (!%p1377_p4) target bundleno = 693 (0x2b5), region = 52 }
 0x286   : > { %731 = vst.msk [vmem:[%s1449_s20 + $0x1c] sm:$0xf] %vm723_vm2, %v1040_v42  ;;  %v1038_v44 = vpack.c.bf16 %v680_v43, %v680_v43 }
 0x288   : > { %729 = vst.msk [vmem:[%s1449_s20 + $0x14] sm:$0xf] %vm723_vm2, %v1038_v44 }
 0x289   : > { %s1544_s24 = smov (!%p741_p8, %s740_s24), 8 }
 0x28a   : > { %s1018_s29 = sshll.u32 %s1544_s24, 6 }
 0x28b   : > { %p1021_p9 = scmp.eq.s32.totalorder %s1018_s29, 0 }
 0x28c   : > { %s1480_s30 = sshrl.u32 (!%p1021_p9), %s1544_s24, 3 }
 0x28d   : > { %749 = sbr.rel (%p1021_p9) target bundleno = 693 (0x2b5), region = 56  ;;  %p1022_p10 = scmp.le.s32.totalorder (!%p1021_p9), %s1480_s30, 0 }
 0x292   : > { %932 = sbr.rel (%p1022_p10) target bundleno = 676 (0x2a4), region = 128  ;;  %s1537_s27 = smov (!%p1022_p10), %s1474_s26 }
 0x293   : > { %s1538_s9 = smov (!%p1022_p10), %s1449_s20  ;;  %s1489_s12 = smov (!%p1022_p10), 0  }
 0x294   : > { %s1491_s10 = smov (!%p1022_p10), 0  }
 0x297 LB: >> { %v766_v45 = vld [vmem:[%s1286_s9] sm:$0xf]  ;;  %v768_v46 = vld [vmem:[%s1286_s9 + $0x4] sm:$0xf]  ;;  %v770_v47 = vld [vmem:[%s1286_s9 + $0x8] sm:$0xf]  ;;  %s1294_s10 = sphi %s1491_s10, %s760_s10   ;;  %s1290_s12 = sphi %s1489_s12, %s1539_s12   ;;  %s1286_s9 = sphi %s1538_s9, %s787_s9   ;;  %s1282_s27 = sphi %s1537_s27, %s788_s27  }
 0x298   : >> { %767 = vst [vmem:[%s1282_s27] sm:$0xf] %v766_v45  ;;  %769 = vst [vmem:[%s1282_s27 + $0x4] sm:$0xf] %v768_v46  ;;  %v772_v48 = vld [vmem:[%s1286_s9 + $0xc] sm:$0xf]  ;;  %s782_s11 = sadd.s32 1, %s1290_s12 }
 0x299   : >> { %771 = vst [vmem:[%s1282_s27 + $0x8] sm:$0xf] %v770_v47  ;;  %v774_v49 = vld [vmem:[%s1286_s9 + $0x10] sm:$0xf]  ;;  %v776_v50 = vld [vmem:[%s1286_s9 + $0x14] sm:$0xf]  ;;  %p783_p11 = scmp.ge.s32.totalorder %s782_s11, %s1480_s30 }
 0x29a   : >> { %773 = vst [vmem:[%s1282_s27 + $0xc] sm:$0xf] %v772_v48  ;;  %775 = vst [vmem:[%s1282_s27 + $0x10] sm:$0xf] %v774_v49  ;;  %v778_v51 = vld [vmem:[%s1286_s9 + $0x18] sm:$0xf] }
 0x29b   : >> { %777 = vst [vmem:[%s1282_s27 + $0x14] sm:$0xf] %v776_v50  ;;  %v780_v52 = vld [vmem:[%s1286_s9 + $0x1c] sm:$0xf]  ;;  %779 = vst [vmem:[%s1282_s27 + $0x18] sm:$0xf] %v778_v51 }
 0x29c   : >> { %781 = vst [vmem:[%s1282_s27 + $0x1c] sm:$0xf] %v780_v52  ;;  %s1546_s11 = smov (%p783_p11, %s782_s11), 0  ;;  %s760_s10 = sadd.s32 1, %s1294_s10  }
 0x29d   : >> { %s1023_s13 = sshll.u32 %s1546_s11, 5  ;;  %p759_p12 = scmp.ge.s32.totalorder %s760_s10, %s1480_s30 }
 0x29e   : >> { %s787_s9 = scalar_lea.vmem %s1449_s20, %s1023_s13 [#allocation2]   ;;  %s788_s27 = scalar_lea.vmem %s1474_s26, %s1023_s13  }
 0x29f   : >> { %s1539_s12 = smov %s1546_s11  ;;  %762 = sbr.rel (!%p759_p12) target bundleno = 663 (0x297), region = 134 }
 0x2a4 PF: > { %s1510_s14 = sand.u32 7, %s1544_s24   ;;  %s1042_s15 = sshll.u32 %s1480_s30, 5 }
 0x2a5   : > { %s793_s16 = scalar_lea.vmem %s1449_s20, %s1042_s15 [#allocation2]   ;;  %s795_s17 = scalar_lea.vmem %s1474_s26, %s1042_s15  }
 0x2a6   : > { %p1028_p13 = scmp.le.s32.totalorder %s1510_s14, 0 }
 0x2a7   : > { %s1296_s18 = smov (!%p1028_p13), %s795_s17   ;;  %s1300_s19 = smov (!%p1028_p13), %s793_s16  }
 0x2a8   : > { %946 = sbr.rel (%p1028_p13) target bundleno = 693 (0x2b5), region = 139  ;;  %s1304_s21 = smov (!%p1028_p13), 0  }
 0x2a9   : > { %s1308_s22 = smov (!%p1028_p13), 0  }
 0x2ad LB: >> { %v805_v53 = vld [vmem:[%s1302_s19] sm:$0xf]  ;;  %s807_s24 = sadd.s32 1, %s1306_s21  ;;  %s799_s22 = sadd.s32 1, %s1310_s22   ;;  %s1310_s22 = sphi %s1308_s22, %s799_s22   ;;  %s1306_s21 = sphi %s1304_s21, %s1305_s21   ;;  %s1302_s19 = sphi %s1300_s19, %s812_s19   ;;  %s1298_s18 = sphi %s1296_s18, %s813_s18  }
 0x2ae   : >> { %806 = vst [vmem:[%s1298_s18] sm:$0xf] %v805_v53  ;;  %p808_p0 = scmp.ge.s32.totalorder %s807_s24, %s1510_s14  ;;  %p798_p1 = scmp.ge.s32.totalorder %s799_s22, %s1510_s14 }
 0x2b0   : >> { %s1548_s24 = smov (%p808_p0, %s807_s24), 0  ;;  %801 = sbr.rel (!%p798_p1) target bundleno = 685 (0x2ad), region = 145 }
 0x2b1   : >> { %s1029_s20 = sshll.u32 %s1548_s24, 2  ;;  %s1305_s21 = smov %s1548_s24  }
 0x2b2   : >> { %s812_s19 = scalar_lea.vmem %s793_s16, %s1029_s20 [#allocation2]   ;;  %s813_s18 = scalar_lea.vmem %s795_s17, %s1029_s20  }
 0x2b5 PF: > { %p14_p2 = scmp.ge.s32.totalorder %s1367_s28, 4   ;;  %s1540_s24 = smov %s1274_s25 }
 0x2b6   : > { %s1541_s25 = smov %s1375_s8  ;;  %s1542_s26 = smov %s1367_s28 }
 0x2b7   :  { %16 = sbr.rel (!%p14_p2) target bundleno = 2 (0x2), region = 156 }

</bundles_post_ra>
